<compile_context>
chip_gen: v5e
topology: v5e:2x2
jax: 0.10.0
libtpu: 0.0.40
codegen_flags: <defaults>
</compile_context>

<pallas_src>
import functools

import jax
import jax.numpy as jnp
from jax.experimental import pallas as pl
from jax.experimental.pallas import tpu as pltpu


def _round_up(x: int, m: int) -> int:
    return ((x + m - 1) // m) * m


# --------------------------------------------------------------------------
# Hardware probes (perf heuristics only; every probe has a safe fallback).
# --------------------------------------------------------------------------
def _tpu_info():
    """Returns (mxu_m_align, two_tensorcores, vmem_capacity_bytes)."""
    kind = ""
    try:
        kind = jax.devices()[0].device_kind.lower()
    except Exception:
        pass
    is_v5 = "v5" in kind
    is_v7 = ("v7" in kind) or ("7x" in kind)
    mxu_align = 128 if is_v5 else 256        # v5e: 4x128^2 MXU; v6e/v7x: 2x256^2
    two_tc = is_v7                           # v7x: 2 TensorCores per chip
    try:
        vmem_cap = int(pltpu.get_tpu_info().vmem_capacity_bytes)
    except Exception:
        vmem_cap = (64 if is_v7 else 128) * 1024 * 1024
    return mxu_align, two_tc, vmem_cap


@functools.lru_cache(maxsize=None)
def _buffered_supported() -> bool:
    """Feature probe: does this jax accept pipeline_mode=pl.Buffered(k)?

    Construction-only check (nothing is compiled or executed here), so it
    cannot mask a genuine kernel failure.
    """
    if not hasattr(pl, "Buffered"):
        return False
    try:
        pl.BlockSpec((16, 128), lambda i: (i, 0), pipeline_mode=pl.Buffered(3))
        return True
    except TypeError:
        return False


# --------------------------------------------------------------------------
# Kernel
# --------------------------------------------------------------------------
def mlp_kernel(x_ref,
               w1_ref, b1_ref,
               w2_ref, b2_ref,
               w3_ref, b3_ref,
               w4_ref, b4_ref,
               o_ref):
    """Fused 4-layer MLP on one (block_b, ndIn) batch tile.

    Matmul operands are in the compute dtype (bf16 by default -> MXU native);
    accumulation, bias adds and ReLUs are f32.  Hidden activations are re-cast
    only to feed the next matmul.
    """
    cdt = w1_ref.dtype

    h = jnp.dot(x_ref[...], w1_ref[...],
                preferred_element_type=jnp.float32) + b1_ref[...]
    h = jnp.maximum(h, 0.0)

    h = jnp.dot(h.astype(cdt), w2_ref[...],
                preferred_element_type=jnp.float32) + b2_ref[...]
    h = jnp.maximum(h, 0.0)

    h = jnp.dot(h.astype(cdt), w3_ref[...],
                preferred_element_type=jnp.float32) + b3_ref[...]
    h = jnp.maximum(h, 0.0)

    out = jnp.dot(h.astype(cdt), w4_ref[...],
                  preferred_element_type=jnp.float32) + b4_ref[...]
    o_ref[...] = out.astype(o_ref.dtype)


# --------------------------------------------------------------------------
# pallas_call builder
# --------------------------------------------------------------------------
def _build_forward(*, block_b, ndIn, nN, ndOut, B_pad, n_steps,
                   x_pipeline_mode, vmem_limit_bytes, cost_estimate):
    if x_pipeline_mode is not None:
        x_spec = pl.BlockSpec((block_b, ndIn), lambda i: (i, 0),
                              pipeline_mode=x_pipeline_mode)
    else:
        x_spec = pl.BlockSpec((block_b, ndIn), lambda i: (i, 0))

    def const_spec(shape):
        # Constant index map: the pipeline keeps this block resident in VMEM
        # (no re-DMA after the first grid step).
        return pl.BlockSpec(shape, lambda i: (0, 0))

    return pl.pallas_call(
        mlp_kernel,
        out_shape=jax.ShapeDtypeStruct((B_pad, ndOut), jnp.float32),
        grid_spec=pltpu.PrefetchScalarGridSpec(
            num_scalar_prefetch=0,
            grid=(n_steps,),
            in_specs=[
                x_spec,
                const_spec((ndIn, nN)),  const_spec((1, nN)),
                const_spec((nN, nN)),    const_spec((1, nN)),
                const_spec((nN, nN)),    const_spec((1, nN)),
                const_spec((nN, ndOut)), const_spec((1, ndOut)),
            ],
            # Unpadded, narrow output block: last dim equals the full array
            # dim (legal), HBM writeback stays at ndOut*4 bytes/row.
            out_specs=pl.BlockSpec((block_b, ndOut), lambda i: (i, 0)),
        ),
        compiler_params=pltpu.CompilerParams(
            dimension_semantics=("parallel",),
            vmem_limit_bytes=vmem_limit_bytes),
        cost_estimate=cost_estimate,
    )


# --------------------------------------------------------------------------
# Tiling / VMEM heuristics
# --------------------------------------------------------------------------
def _pick_block_b(B, *, mxu_align, two_tc):
    cap = 2048 if two_tc else 4096            # bigger tiles on single-TC parts
    min_steps = 2 if (two_tc and B > 256) else 1   # keep both v7x TCs busy
    n_steps = max(min_steps, pl.cdiv(B, cap))
    if n_steps == 1:
        return B                              # one full-array block: latency floor
    return min(cap, _round_up(pl.cdiv(B, n_steps), mxu_align))


def _vmem_estimate(block_b, ndIn, nN, ndOut, itemsize, n_in_buf):
    weight_bytes = (ndIn * nN + 2 * nN * nN + nN * ndOut) * itemsize
    bias_bytes = (3 * nN + ndOut) * 4
    # Weights/biases are double-buffered by the standard pipeline even though
    # their index map is constant (only the VMEM footprint doubles, not DMA).
    resident = 2 * (weight_bytes + bias_bytes)
    io_bytes = (n_in_buf * block_b * ndIn * itemsize      # x tiles
                + 2 * block_b * ndOut * 4)                # output tiles
    # Live hidden activations inside the body (f32 acc + compute-dtype recast),
    # NOT double-buffered.
    act_bytes = block_b * nN * (4 + itemsize)
    return resident + io_bytes + act_bytes


# --------------------------------------------------------------------------
# Public forward
# --------------------------------------------------------------------------
def neural_network_forward(x, params, *, block_b=None,
                           compute_dtype=jnp.bfloat16):
    """Forward pass of the MLP as a single fused Pallas kernel.

    x:      (B, ndIn) float32
    params: dict with w1..w4 pre-transposed to (in, out) and b1..b4 of (1, out).
    """
    B, ndIn = x.shape
    nN = params["w1"].shape[1]
    ndOut = params["w4"].shape[1]

    mxu_align, two_tc, vmem_cap = _tpu_info()
    cdt = jnp.dtype(compute_dtype)

    # ---- batch tiling ------------------------------------------------------
    if block_b is None:
        block_b = _pick_block_b(B, mxu_align=mxu_align, two_tc=two_tc)
    else:
        block_b = max(1, min(int(block_b), B))
        if block_b < B:
            block_b = _round_up(block_b, 16)   # bf16 min tile is (16, 128)
        if block_b >= B:
            block_b = B

    # Shrink the batch tile if the activation slab would blow the VMEM budget
    # (weights are the fixed part and stay resident).
    budget = int(vmem_cap * 0.70)
    while (block_b > 256 and
           _vmem_estimate(block_b, ndIn, nN, ndOut, cdt.itemsize, 3) > budget):
        block_b = max(256, _round_up(block_b // 2, 16))
    # TODO(synk): if the resident weight set alone (2*nN*nN in compute dtype,
    # double-buffered) exceeds the VMEM budget (nN >~ 3-4k on v7x's 64 MiB),
    # K-tile the nN x nN layers over an extra "arbitrary" grid axis with an
    # f32 VMEM accumulator instead of relying on batch-tile shrinking.

    B_pad = _round_up(B, block_b)
    n_steps = B_pad // block_b

    # Deeper input pipelining only pays off on long grids; the extra buffer
    # costs just block_b*ndIn*itemsize bytes.
    x_mode = pl.Buffered(3) if (n_steps >= 4 and _buffered_supported()) else None
    n_in_buf = 3 if x_mode is not None else 2

    # ---- one-time casts / padding (outside the kernel, outside the grid loop)
    xc = x
    if B_pad != B:
        xc = jnp.pad(xc, ((0, B_pad - B), (0, 0)))
    xc = xc.astype(cdt)

    w1 = params["w1"].astype(cdt)
    w2 = params["w2"].astype(cdt)
    w3 = params["w3"].astype(cdt)
    w4 = params["w4"].astype(cdt)
    b1 = params["b1"].astype(jnp.float32)
    b2 = params["b2"].astype(jnp.float32)
    b3 = params["b3"].astype(jnp.float32)
    b4 = params["b4"].astype(jnp.float32)

    args = (xc, w1, b1, w2, b2, w3, b3, w4, b4)

    # ---- scoped VMEM limit ---------------------------------------------------
    est = _vmem_estimate(block_b, ndIn, nN, ndOut, cdt.itemsize, n_in_buf)
    vmem_limit_bytes = None
    if est > 14 * 1024 * 1024:                 # above the smallest default limit
        # ~25% slack over the estimate, but never claim (almost) all of VMEM:
        # leave headroom for neighbouring XLA fusions' scratch.
        ceiling = max(vmem_cap - (16 << 20), (vmem_cap * 3) // 4)
        vmem_limit_bytes = min(int(est * 1.25) + (2 << 20), ceiling)
        vmem_limit_bytes = max(vmem_limit_bytes, min(est, vmem_cap))

    # ---- advisory cost estimate ----------------------------------------------
    flops = 2 * B_pad * (ndIn * nN + 2 * nN * nN + nN * ndOut)
    bytes_accessed = (sum(int(a.size) * a.dtype.itemsize for a in args)
                      + B_pad * ndOut * 4)
    cost = pl.CostEstimate(flops=flops, transcendentals=0,
                           bytes_accessed=bytes_accessed)

    fwd = _build_forward(block_b=block_b, ndIn=ndIn, nN=nN, ndOut=ndOut,
                         B_pad=B_pad, n_steps=n_steps,
                         x_pipeline_mode=x_mode,
                         vmem_limit_bytes=vmem_limit_bytes,
                         cost_estimate=cost)
    out = fwd(*args)
    if B_pad != B:
        out = out[:B]
    return out


# --------------------------------------------------------------------------
# Parameter init & reference (module semantics)
# --------------------------------------------------------------------------
def init_params(key, nd_in, nd_out, n_neurons):
    """Deterministic init mimicking nn.Linear's U(-1/sqrt(fan_in), +1/sqrt(fan_in)).

    Weights stored pre-transposed as (in, out); biases as (1, out).
    NOTE (perf): with n_neurons=32 / nd_in=4 the MXU runs at <=12% lane
    occupancy on v6e/v7x; if the model allows, widening n_neurons to 128 (or
    batching four 32-wide nets into one 128-wide block) is nearly free.
    """
    dims = [(nd_in, n_neurons), (n_neurons, n_neurons),
            (n_neurons, n_neurons), (n_neurons, nd_out)]
    params = {}
    keys = jax.random.split(key, 2 * len(dims))
    for li, (fan_in, fan_out) in enumerate(dims, start=1):
        bound = 1.0 / (fan_in ** 0.5)
        wk, bk = keys[2 * (li - 1)], keys[2 * (li - 1) + 1]
        params[f"w{li}"] = jax.random.uniform(
            wk, (fan_in, fan_out), jnp.float32, minval=-bound, maxval=bound)
        params[f"b{li}"] = jax.random.uniform(
            bk, (1, fan_out), jnp.float32, minval=-bound, maxval=bound)
    return params


def reference_forward(x, params):
    h = jnp.maximum(x @ params["w1"] + params["b1"], 0.0)
    h = jnp.maximum(h @ params["w2"] + params["b2"], 0.0)
    h = jnp.maximum(h @ params["w3"] + params["b3"], 0.0)
    return h @ params["w4"] + params["b4"]


if __name__ == "__main__":
    # Small shapes consistent with the module: a plain MLP on feature vectors.
    B, ND_IN, ND_OUT, N_NEURONS = 8, 4, 4, 32

    key = jax.random.PRNGKey(0)
    kx, kp = jax.random.split(key)
    x = jax.random.normal(kx, (B, ND_IN), jnp.float32)
    params = init_params(kp, ND_IN, ND_OUT, N_NEURONS)

    out = neural_network_forward(x, params)
    out = jax.block_until_ready(out)

    ref = reference_forward(x, params)  # f32 reference (module semantics)
    assert out.shape == (B, ND_OUT)
    # bf16 matmul inputs + f32 accumulation => loosened tolerance vs f32 ref.
    max_err = float(jnp.max(jnp.abs(out - ref)))
    assert jnp.allclose(out, ref, atol=5e-2, rtol=5e-2), max_err

    print("KERNEL_OK")
</pallas_src>

<mosaic_0001>
module attributes {stable_mosaic.version = 11 : i64} {
  func.func @mlp_kernel(%arg0: i32, %arg1: memref<8x4xbf16, #tpu.memory_space<vmem>>, %arg2: memref<4x32xbf16, #tpu.memory_space<vmem>>, %arg3: memref<1x32xf32, #tpu.memory_space<vmem>>, %arg4: memref<32x32xbf16, #tpu.memory_space<vmem>>, %arg5: memref<1x32xf32, #tpu.memory_space<vmem>>, %arg6: memref<32x32xbf16, #tpu.memory_space<vmem>>, %arg7: memref<1x32xf32, #tpu.memory_space<vmem>>, %arg8: memref<32x4xbf16, #tpu.memory_space<vmem>>, %arg9: memref<1x4xf32, #tpu.memory_space<vmem>>, %arg10: memref<8x4xf32, #tpu.memory_space<vmem>>) attributes {dimension_semantics = [#tpu.dimension_semantics<parallel>], iteration_bounds = array<i64: 1>, scalar_prefetch = 0 : i64, scratch_operands = 0 : i64, tpu.core_type = #tpu.core_type<tc>, window_params = [{transform_indices = @transform_0, window_bounds = array<i64: 8, 4>}, {pipeline_mode = #tpu.pipeline_mode<synchronous>, transform_indices = @transform_1, window_bounds = array<i64: 4, 32>}, {pipeline_mode = #tpu.pipeline_mode<synchronous>, transform_indices = @transform_2, window_bounds = array<i64: 1, 32>}, {pipeline_mode = #tpu.pipeline_mode<synchronous>, transform_indices = @transform_3, window_bounds = array<i64: 32, 32>}, {pipeline_mode = #tpu.pipeline_mode<synchronous>, transform_indices = @transform_4, window_bounds = array<i64: 1, 32>}, {pipeline_mode = #tpu.pipeline_mode<synchronous>, transform_indices = @transform_5, window_bounds = array<i64: 32, 32>}, {pipeline_mode = #tpu.pipeline_mode<synchronous>, transform_indices = @transform_6, window_bounds = array<i64: 1, 32>}, {pipeline_mode = #tpu.pipeline_mode<synchronous>, transform_indices = @transform_7, window_bounds = array<i64: 32, 4>}, {pipeline_mode = #tpu.pipeline_mode<synchronous>, transform_indices = @transform_8, window_bounds = array<i64: 1, 4>}, {transform_indices = @transform_9, window_bounds = array<i64: 8, 4>}]} {
    %c0 = arith.constant 0 : index
    %c0_0 = arith.constant 0 : index
    %0 = vector.load %arg1[%c0, %c0_0] : memref<8x4xbf16, #tpu.memory_space<vmem>>, vector<8x4xbf16>
    %c0_1 = arith.constant 0 : index
    %c0_2 = arith.constant 0 : index
    %1 = vector.load %arg2[%c0_1, %c0_2] : memref<4x32xbf16, #tpu.memory_space<vmem>>, vector<4x32xbf16>
    %cst = arith.constant dense<0.000000e+00> : vector<8x32xf32>
    %2 = tpu.matmul %0, %1, %cst {dimension_numbers = #tpu.dot_dimension_numbers<[1], [0], [0], [1], [0, 0, 1, 1], [], []>} : vector<8x4xbf16>, vector<4x32xbf16>, vector<8x32xf32> -> vector<8x32xf32>
    %c0_3 = arith.constant 0 : index
    %c0_4 = arith.constant 0 : index
    %3 = vector.load %arg3[%c0_3, %c0_4] : memref<1x32xf32, #tpu.memory_space<vmem>>, vector<1x32xf32>
    %4 = vector.broadcast %3 : vector<1x32xf32> to vector<8x32xf32>
    %5 = arith.addf %2, %4 : vector<8x32xf32>
    %cst_5 = arith.constant 0.000000e+00 : f32
    %6 = vector.broadcast %cst_5 : f32 to vector<8x32xf32>
    %7 = arith.maximumf %5, %6 : vector<8x32xf32>
    %8 = arith.truncf %7 : vector<8x32xf32> to vector<8x32xbf16>
    %c0_6 = arith.constant 0 : index
    %c0_7 = arith.constant 0 : index
    %9 = vector.load %arg4[%c0_6, %c0_7] : memref<32x32xbf16, #tpu.memory_space<vmem>>, vector<32x32xbf16>
    %cst_8 = arith.constant dense<0.000000e+00> : vector<8x32xf32>
    %10 = tpu.matmul %8, %9, %cst_8 {dimension_numbers = #tpu.dot_dimension_numbers<[1], [0], [0], [1], [0, 0, 1, 1], [], []>} : vector<8x32xbf16>, vector<32x32xbf16>, vector<8x32xf32> -> vector<8x32xf32>
    %c0_9 = arith.constant 0 : index
    %c0_10 = arith.constant 0 : index
    %11 = vector.load %arg5[%c0_9, %c0_10] : memref<1x32xf32, #tpu.memory_space<vmem>>, vector<1x32xf32>
    %12 = vector.broadcast %11 : vector<1x32xf32> to vector<8x32xf32>
    %13 = arith.addf %10, %12 : vector<8x32xf32>
    %cst_11 = arith.constant 0.000000e+00 : f32
    %14 = vector.broadcast %cst_11 : f32 to vector<8x32xf32>
    %15 = arith.maximumf %13, %14 : vector<8x32xf32>
    %16 = arith.truncf %15 : vector<8x32xf32> to vector<8x32xbf16>
    %c0_12 = arith.constant 0 : index
    %c0_13 = arith.constant 0 : index
    %17 = vector.load %arg6[%c0_12, %c0_13] : memref<32x32xbf16, #tpu.memory_space<vmem>>, vector<32x32xbf16>
    %cst_14 = arith.constant dense<0.000000e+00> : vector<8x32xf32>
    %18 = tpu.matmul %16, %17, %cst_14 {dimension_numbers = #tpu.dot_dimension_numbers<[1], [0], [0], [1], [0, 0, 1, 1], [], []>} : vector<8x32xbf16>, vector<32x32xbf16>, vector<8x32xf32> -> vector<8x32xf32>
    %c0_15 = arith.constant 0 : index
    %c0_16 = arith.constant 0 : index
    %19 = vector.load %arg7[%c0_15, %c0_16] : memref<1x32xf32, #tpu.memory_space<vmem>>, vector<1x32xf32>
    %20 = vector.broadcast %19 : vector<1x32xf32> to vector<8x32xf32>
    %21 = arith.addf %18, %20 : vector<8x32xf32>
    %cst_17 = arith.constant 0.000000e+00 : f32
    %22 = vector.broadcast %cst_17 : f32 to vector<8x32xf32>
    %23 = arith.maximumf %21, %22 : vector<8x32xf32>
    %24 = arith.truncf %23 : vector<8x32xf32> to vector<8x32xbf16>
    %c0_18 = arith.constant 0 : index
    %c0_19 = arith.constant 0 : index
    %25 = vector.load %arg8[%c0_18, %c0_19] : memref<32x4xbf16, #tpu.memory_space<vmem>>, vector<32x4xbf16>
    %cst_20 = arith.constant dense<0.000000e+00> : vector<8x4xf32>
    %26 = tpu.matmul %24, %25, %cst_20 {dimension_numbers = #tpu.dot_dimension_numbers<[1], [0], [0], [1], [0, 0, 1, 1], [], []>} : vector<8x32xbf16>, vector<32x4xbf16>, vector<8x4xf32> -> vector<8x4xf32>
    %c0_21 = arith.constant 0 : index
    %c0_22 = arith.constant 0 : index
    %27 = vector.load %arg9[%c0_21, %c0_22] : memref<1x4xf32, #tpu.memory_space<vmem>>, vector<1x4xf32>
    %28 = vector.broadcast %27 : vector<1x4xf32> to vector<8x4xf32>
    %29 = arith.addf %26, %28 : vector<8x4xf32>
    %c0_23 = arith.constant 0 : index
    %c0_24 = arith.constant 0 : index
    %30 = vector.load %arg10[%c0_23, %c0_24] : memref<8x4xf32, #tpu.memory_space<vmem>>, vector<8x4xf32>
    tpu.vector_store %arg10[%c0_23, %c0_24], %29 {strides = array<i32>} : memref<8x4xf32, #tpu.memory_space<vmem>>, vector<8x4xf32>,
    return
  }
  func.func @transform_0(%arg0: i32) -> (i32, i32) {
    %c0_i32 = arith.constant 0 : i32
    %c0_i32_0 = arith.constant 0 : i32
    return %arg0, %c0_i32 : i32, i32
  }
  func.func @transform_1(%arg0: i32) -> (i32, i32) {
    %c0_i32 = arith.constant 0 : i32
    %c0_i32_0 = arith.constant 0 : i32
    %c0_i32_1 = arith.constant 0 : i32
    return %c0_i32, %c0_i32_0 : i32, i32
  }
  func.func @transform_2(%arg0: i32) -> (i32, i32) {
    %c0_i32 = arith.constant 0 : i32
    %c0_i32_0 = arith.constant 0 : i32
    %c0_i32_1 = arith.constant 0 : i32
    return %c0_i32, %c0_i32_0 : i32, i32
  }
  func.func @transform_3(%arg0: i32) -> (i32, i32) {
    %c0_i32 = arith.constant 0 : i32
    %c0_i32_0 = arith.constant 0 : i32
    %c0_i32_1 = arith.constant 0 : i32
    return %c0_i32, %c0_i32_0 : i32, i32
  }
  func.func @transform_4(%arg0: i32) -> (i32, i32) {
    %c0_i32 = arith.constant 0 : i32
    %c0_i32_0 = arith.constant 0 : i32
    %c0_i32_1 = arith.constant 0 : i32
    return %c0_i32, %c0_i32_0 : i32, i32
  }
  func.func @transform_5(%arg0: i32) -> (i32, i32) {
    %c0_i32 = arith.constant 0 : i32
    %c0_i32_0 = arith.constant 0 : i32
    %c0_i32_1 = arith.constant 0 : i32
    return %c0_i32, %c0_i32_0 : i32, i32
  }
  func.func @transform_6(%arg0: i32) -> (i32, i32) {
    %c0_i32 = arith.constant 0 : i32
    %c0_i32_0 = arith.constant 0 : i32
    %c0_i32_1 = arith.constant 0 : i32
    return %c0_i32, %c0_i32_0 : i32, i32
  }
  func.func @transform_7(%arg0: i32) -> (i32, i32) {
    %c0_i32 = arith.constant 0 : i32
    %c0_i32_0 = arith.constant 0 : i32
    %c0_i32_1 = arith.constant 0 : i32
    return %c0_i32, %c0_i32_0 : i32, i32
  }
  func.func @transform_8(%arg0: i32) -> (i32, i32) {
    %c0_i32 = arith.constant 0 : i32
    %c0_i32_0 = arith.constant 0 : i32
    %c0_i32_1 = arith.constant 0 : i32
    return %c0_i32, %c0_i32_0 : i32, i32
  }
  func.func @transform_9(%arg0: i32) -> (i32, i32) {
    %c0_i32 = arith.constant 0 : i32
    %c0_i32_0 = arith.constant 0 : i32
    return %arg0, %c0_i32 : i32, i32
  }
}

</mosaic_0001>

<bundles_post_ra>
// kernel: tpu_custom_call.1
= control target key start
LH: loop header
LB: loop body
LE: loop exit
PB: predicated region body
PF: predicated region fallthrough
CT: control target
= control target key end

     0   :  { %14 = vsyncpa [#allocation3], 0  ;;  %s264_s12 = smov [#allocation2]   ;;  %s265_s14 = smov 64   ;;  %s358_s0 = inlined_call_operand.vmem [shape: bf16[8,4], index: 0, kind: input, shape index: {}]   ;;  %s359_s1 = inlined_call_operand.vmem [shape: bf16[4,32], index: 1, kind: input, shape index: {}]   ;;  %s360_s2 = inlined_call_operand.vmem [shape: f32[1,32], index: 2, kind: input, shape index: {}]   ;;  %s361_s3 = inlined_call_operand.vmem [shape: bf16[32,32], index: 3, kind: input, shape index: {}]   ;;  %s362_s4 = inlined_call_operand.vmem [shape: f32[1,32], index: 4, kind: input, shape index: {}]   ;;  %s363_s5 = inlined_call_operand.hbm [shape: bf16[32,32], index: 5, kind: input, shape index: {}]   ;;  %s364_s6 = inlined_call_operand.vmem [shape: f32[1,32], index: 6, kind: input, shape index: {}]   ;;  %s365_s7 = inlined_call_operand.vmem [shape: bf16[32,4], index: 7, kind: input, shape index: {}]   ;;  %s366_s8 = inlined_call_operand.vmem [shape: f32[1,4], index: 8, kind: input, shape index: {}]   ;;  %s367_s9 = inlined_call_operand.vmem [shape: f32[8,4], index: 9, kind: output, shape index: {}]  }
   0x1   :  { %s29_s11 = sshll.u32 %s363_s5, 4  ;;  %s31_s13 = sshll.u32 %s264_s12, 4  ;;  %s30_s11 = int_to_ptr.hbm [resolvable:$true] %s29_s11  ;;  %s32_s13 = int_to_ptr.vmem [resolvable:$true] %s31_s13 }
   0x2   :  { %s266_s15 = smov 4  }
   0x3   :  { %37 = dma.hbm_to_vmem [thread:$0]  %s30_s11, 256, %s32_s13, [#allocation3], %s265_s14, %s265_s14, %s266_s15  }
   0x4   :  { %262 = dma.done.wait [#allocation3], 256  }
   0x5   :  { %263 = vsyncadd [#allocation3], 4294967040  ;;  %vm59_vm0 = vcmask 1041408   ;;  %v50_v0 = vld [vmem:[%s359_s1] sm:$0x3]  ;;  %vm55_vm1 = vcmask 31744  }
   0x6   :  { %v61_v1 = vsel %vm59_vm0, %v50_v0, 0  ;;  %v49_v2 = vld [vmem:[%s358_s0] sm:$0xf]  ;;  %v226_v3 = vld [vmem:[%s361_s3 + $0x8] sm:$0xff]  ;;  %vm98_vm2 = vcmask 261120  }
   0x7   :  { %70 = vmatpush.bf16.msra.mxu0 %v61_v1  ;;  %108 = vmatpush.bf16.msra.mxu1 %v226_v3  ;;  %v225_v4 = vld [vmem:[%s361_s3] sm:$0xff]  ;;  %v228_v11 = vld [vmem:[#allocation2 + $0x8] sm:$0xff] }
   0x8   :  { %v234_v5 = vld [vmem:[%s360_s2] ss:$0 sm:$0xff]  ;;  %146 = vmatpush.bf16.msra.mxu2 %v228_v11  ;;  %v230_v19 = vld [vmem:[%s365_s7 + $0x8] sm:$0xff] }
   0x9   :  { %v227_v12 = vld [vmem:[#allocation2] sm:$0xff]  ;;  %184 = vmatpush.bf16.msra.mxu3 %v230_v19 }
   0xa   :  { %197 = vmatmul.msk.bf16.vlgmr.msra.gmra.mxu0 %vm55_vm1, %v49_v2  ;;  %v235_v13 = vld [vmem:[%s362_s4] ss:$0 sm:$0xff] }
   0xb   :  { %109 = vmatpush.bf16.msra.mxu1 %v225_v4  ;;  %v229_v20 = vld [vmem:[%s365_s7] sm:$0xff] }
   0xc   :  { %147 = vmatpush.bf16.msra.mxu2 %v227_v12  ;;  %v236_v21 = vld [vmem:[%s364_s6] ss:$0 sm:$0xff] }
   0xd   :  { %185 = vmatpush.bf16.msra.mxu3 %v229_v20  ;;  %v237_v27 = vld [vmem:[%s366_s8] ss:$0 sm:$0xff] }
  0x87   :  { %v72_v6 = vpop.f32.mrf.mxu0 }
  0x88   :  { %v73_v7 = vadd.f32 %v234_v5, %v72_v6 }
  0x8a   :  { %v76_v8 = vmax.f32 %v73_v7, 0.0 }
  0x8c   :  { %v77_v9 = vpack.c.bf16 %v76_v8, %v76_v8 }
  0x8e   :  { %206 = vmatmul.msk.bf16.vlgmr.msra.gmra.mxu1 %vm98_vm2, %v77_v9 }
  0x8f   :  { %v74_v10 = vpop.f32.mrf.mxu0 }
 0x10b   :  { %v111_v14 = vpop.f32.mrf.mxu1 }
 0x10c   :  { %v112_v15 = vadd.f32 %v235_v13, %v111_v14 }
 0x10e   :  { %v115_v16 = vmax.f32 %v112_v15, 0.0 }
 0x110   :  { %v116_v17 = vpack.c.bf16 %v115_v16, %v115_v16 }
 0x112   :  { %215 = vmatmul.msk.bf16.vlgmr.msra.gmra.mxu2 %vm98_vm2, %v116_v17 }
 0x113   :  { %v113_v18 = vpop.f32.mrf.mxu1 }
 0x195   :  { %v149_v22 = vpop.f32.mrf.mxu2 }
 0x196   :  { %v150_v23 = vadd.f32 %v236_v21, %v149_v22 }
 0x198   :  { %v153_v24 = vmax.f32 %v150_v23, 0.0 }
 0x19a   :  { %v154_v25 = vpack.c.bf16 %v153_v24, %v153_v24 }
 0x19c   :  { %224 = vmatmul.msk.bf16.vlgmr.msra.gmra.mxu3 %vm98_vm2, %v154_v25 }
 0x19d   :  { %v151_v26 = vpop.f32.mrf.mxu2 }
 0x21f   :  { %v187_v28 = vpop.f32.mrf.mxu3 }
 0x220   :  { %v188_v29 = vadd.f32 %v237_v27, %v187_v28 }
 0x222   :  { %191 = vst.msk [vmem:[%s367_s9] sm:$0xff] %vm55_vm1, %v188_v29 }
 0x227   :  { %v189_v30 = vpop.f32.mrf.mxu3 }
 0x228   :  { %196 = vsyncpa [#allocation3], 1 }

</bundles_post_ra>
